<compile_context>
chip_gen: v5e
topology: v5e:2x2
jax: 0.10.0
libtpu: 0.0.40
codegen_flags: <defaults>
</compile_context>

<pallas_src>
import functools

import jax
import jax.numpy as jnp
from jax.experimental import pallas as pl
from jax.experimental.pallas import tpu as pltpu


# ----------------------------------------------------------------------------
# Kernel
# ----------------------------------------------------------------------------
def _mhca_kernel(scale, num_heads, x_ref, c_ref, wq_ref, wk_ref, wv_ref,
                 wph_ref, wp_ref, bp_ref, o_ref):
    """Fused multi-head cross-attention for one batch element.

    x_ref   : (1, Nq, C)      query-side tokens
    c_ref   : (1, Nc, C)      complement tokens (concatenated with x in-kernel)
    wq_ref  : (H, C, d)       per-head query weight (already transposed)
    wk_ref  : (H, C, d)       per-head key weight
    wv_ref  : (H, C, d)       per-head value weight
    wph_ref : (H, d, C)       per-head slice of the output-projection weight
    wp_ref  : (C, C)          full output-projection weight (residual path)
    bp_ref  : (1, C)          output-projection bias
    o_ref   : (1, Nq, C)
    """
    x = x_ref[0]                                   # (Nq, C)
    comp = c_ref[0]                                # (Nc, C)
    # torch.cat([x, complement], dim=1) -> keys/values attend over both.
    cat = jnp.concatenate([x, comp], axis=0)       # (Nq + Nc, C)

    # Residual folded through the projection:  (attn_out + x) @ Wp^T + b
    acc = jnp.dot(x, wp_ref[...], preferred_element_type=jnp.float32)
    acc = acc + bp_ref[0]

    for h in range(num_heads):                     # static unroll, H small
        q = jnp.dot(x, wq_ref[h], preferred_element_type=jnp.float32)    # (Nq, d)
        k = jnp.dot(cat, wk_ref[h], preferred_element_type=jnp.float32)  # (Nk, d)
        v = jnp.dot(cat, wv_ref[h], preferred_element_type=jnp.float32)  # (Nk, d)

        # q @ k^T without materializing a transpose.
        s = jax.lax.dot_general(q, k, (((1,), (1,)), ((), ())),
                                preferred_element_type=jnp.float32)
        s = s * scale                                                    # (Nq, Nk)

        # Numerically-stable row softmax (attn_drop is identity at p=0).
        s = s - jnp.max(s, axis=-1, keepdims=True)
        p = jnp.exp(s)
        p = p / jnp.sum(p, axis=-1, keepdims=True)

        oh = jnp.dot(p, v, preferred_element_type=jnp.float32)           # (Nq, d)
        # Head output goes straight through its slice of the projection.
        acc = acc + jnp.dot(oh, wph_ref[h],
                            preferred_element_type=jnp.float32)          # (Nq, C)

    # proj_drop is identity at p=0.
    o_ref[0] = acc.astype(o_ref.dtype)


# ----------------------------------------------------------------------------
# pallas_call wrapper
# ----------------------------------------------------------------------------
@functools.partial(jax.jit, static_argnames=("num_heads",))
def mhca_forward(x, complement, params, *, num_heads):
    """x: (B, Nq, C), complement: (B, Nc, C) -> (B, Nq, C)."""
    B, Nq, C = x.shape
    _, Nc, _ = complement.shape
    d = C // num_heads
    scale = float(d) ** -0.5

    # PyTorch Linear stores weight as (out_features, in_features); transpose
    # so every kernel matmul is a plain (tokens, C) @ (C, out) MXU op.
    wq_t = params["wq"].T                                  # (C, C)
    wk_t = params["wkv"][:C, :].T                          # (C, C)
    wv_t = params["wkv"][C:, :].T                          # (C, C)
    wp_t = params["wp"].T                                  # (C, C)

    # Per-head slabs: output columns h*d:(h+1)*d of Wq/Wk/Wv, input rows
    # h*d:(h+1)*d of Wp.
    wq_h = wq_t.reshape(C, num_heads, d).transpose(1, 0, 2)   # (H, C, d)
    wk_h = wk_t.reshape(C, num_heads, d).transpose(1, 0, 2)   # (H, C, d)
    wv_h = wv_t.reshape(C, num_heads, d).transpose(1, 0, 2)   # (H, C, d)
    wp_h = wp_t.reshape(num_heads, d, C)                       # (H, d, C)
    bp = params["bp"].reshape(1, C)

    kern = functools.partial(_mhca_kernel, scale, num_heads)
    const3 = lambda b: (0, 0, 0)
    const2 = lambda b: (0, 0)
    return pl.pallas_call(
        kern,
        out_shape=jax.ShapeDtypeStruct((B, Nq, C), x.dtype),
        grid=(B,),
        in_specs=[
            pl.BlockSpec((1, Nq, C), lambda b: (b, 0, 0)),
            pl.BlockSpec((1, Nc, C), lambda b: (b, 0, 0)),
            pl.BlockSpec((num_heads, C, d), const3),
            pl.BlockSpec((num_heads, C, d), const3),
            pl.BlockSpec((num_heads, C, d), const3),
            pl.BlockSpec((num_heads, d, C), const3),
            pl.BlockSpec((C, C), const2),
            pl.BlockSpec((1, C), const2),
        ],
        out_specs=pl.BlockSpec((1, Nq, C), lambda b: (b, 0, 0)),
        compiler_params=pltpu.CompilerParams(
            dimension_semantics=("parallel",)),
    )(x, complement, wq_h, wk_h, wv_h, wp_h, wp_t, bp)


# ----------------------------------------------------------------------------
# Pure-JAX reference (mirrors the PyTorch forward, for correctness check)
# ----------------------------------------------------------------------------
def mhca_reference(x, complement, params, *, num_heads):
    B, Nq, C = x.shape
    d = C // num_heads
    scale = float(d) ** -0.5

    cat = jnp.concatenate([x, complement], axis=1)          # (B, Nk, C)
    Nk = cat.shape[1]

    q = x @ params["wq"].T                                  # (B, Nq, C)
    kv = cat @ params["wkv"].T                              # (B, Nk, 2C)
    kv = kv.reshape(B, Nk, 2, num_heads, d).transpose(2, 0, 3, 1, 4)
    k, v = kv[0], kv[1]                                     # (B, H, Nk, d)
    qh = q.reshape(B, Nq, num_heads, d).transpose(0, 2, 1, 3)

    attn = (qh @ k.transpose(0, 1, 3, 2)) * scale
    attn = jax.nn.softmax(attn, axis=-1)
    out = (attn @ v).transpose(0, 2, 1, 3).reshape(B, Nq, C)
    out = out + x
    return out @ params["wp"].T + params["bp"]


# ----------------------------------------------------------------------------
# main
# ----------------------------------------------------------------------------
if __name__ == "__main__":
    # Small shapes consistent with the module: batch=2, seq=8 (query) + 8
    # (complement), dim=32, heads=4 -> head_dim=8.
    B, Nq, Nc, C, H = 2, 8, 8, 32, 4

    key = jax.random.PRNGKey(0)
    k_x, k_c, k_q, k_kv, k_p, k_b = jax.random.split(key, 6)

    bound = float(C) ** -0.5      # PyTorch Linear default init scale
    params = {
        "wq": jax.random.uniform(k_q, (C, C), jnp.float32, -bound, bound),
        "wkv": jax.random.uniform(k_kv, (2 * C, C), jnp.float32, -bound, bound),
        "wp": jax.random.uniform(k_p, (C, C), jnp.float32, -bound, bound),
        "bp": jax.random.uniform(k_b, (C,), jnp.float32, -bound, bound),
    }
    x = jax.random.normal(k_x, (B, Nq, C), jnp.float32)
    complement = jax.random.normal(k_c, (B, Nc, C), jnp.float32)

    out = mhca_forward(x, complement, params, num_heads=H)
    out = jax.block_until_ready(out)
    assert out.shape == (B, Nq, C)

    ref = mhca_reference(x, complement, params, num_heads=H)
    if not jnp.allclose(out, ref, atol=1e-4, rtol=1e-4):
        max_err = float(jnp.max(jnp.abs(out - ref)))
        raise AssertionError(
            f"Pallas MultiHeadCrossAttention mismatch, max abs err = {max_err}")

    # TODO(synk): attn_drop / proj_drop with p > 0 would need pltpu.prng_seed /
    # prng_random_bits inside the kernel; the module default p = 0.0 makes both
    # dropouts the identity, which is what is implemented here.
    print("KERNEL_OK")
</pallas_src>

<mosaic_0001>
module attributes {stable_mosaic.version = 11 : i64} {
  func.func @_mhca_kernel(%arg0: i32, %arg1: memref<1x8x32xf32, #tpu.memory_space<vmem>>, %arg2: memref<1x8x32xf32, #tpu.memory_space<vmem>>, %arg3: memref<4x32x8xf32, #tpu.memory_space<vmem>>, %arg4: memref<4x32x8xf32, #tpu.memory_space<vmem>>, %arg5: memref<4x32x8xf32, #tpu.memory_space<vmem>>, %arg6: memref<4x8x32xf32, #tpu.memory_space<vmem>>, %arg7: memref<32x32xf32, #tpu.memory_space<vmem>>, %arg8: memref<1x32xf32, #tpu.memory_space<vmem>>, %arg9: memref<1x8x32xf32, #tpu.memory_space<vmem>>) attributes {dimension_semantics = [#tpu.dimension_semantics<parallel>], iteration_bounds = array<i64: 2>, scalar_prefetch = 0 : i64, scratch_operands = 0 : i64, tpu.core_type = #tpu.core_type<tc>, window_params = [{transform_indices = @transform_0, window_bounds = array<i64: 1, 8, 32>}, {transform_indices = @transform_1, window_bounds = array<i64: 1, 8, 32>}, {pipeline_mode = #tpu.pipeline_mode<synchronous>, transform_indices = @transform_2, window_bounds = array<i64: 4, 32, 8>}, {pipeline_mode = #tpu.pipeline_mode<synchronous>, transform_indices = @transform_3, window_bounds = array<i64: 4, 32, 8>}, {pipeline_mode = #tpu.pipeline_mode<synchronous>, transform_indices = @transform_4, window_bounds = array<i64: 4, 32, 8>}, {pipeline_mode = #tpu.pipeline_mode<synchronous>, transform_indices = @transform_5, window_bounds = array<i64: 4, 8, 32>}, {pipeline_mode = #tpu.pipeline_mode<synchronous>, transform_indices = @transform_6, window_bounds = array<i64: 32, 32>}, {pipeline_mode = #tpu.pipeline_mode<synchronous>, transform_indices = @transform_7, window_bounds = array<i64: 1, 32>}, {transform_indices = @transform_8, window_bounds = array<i64: 1, 8, 32>}]} {
    %c0 = arith.constant 0 : index
    %c0_0 = arith.constant 0 : index
    %c0_1 = arith.constant 0 : index
    %0 = vector.load %arg1[%c0, %c0_0, %c0_1] : memref<1x8x32xf32, #tpu.memory_space<vmem>>, vector<1x8x32xf32>
    %1 = vector.shape_cast %0 : vector<1x8x32xf32> to vector<8x32xf32>
    %c0_2 = arith.constant 0 : index
    %c0_3 = arith.constant 0 : index
    %c0_4 = arith.constant 0 : index
    %2 = vector.load %arg2[%c0_2, %c0_3, %c0_4] : memref<1x8x32xf32, #tpu.memory_space<vmem>>, vector<1x8x32xf32>
    %3 = vector.shape_cast %2 : vector<1x8x32xf32> to vector<8x32xf32>
    %4 = tpu.concatenate %1, %3 in 0 : vector<8x32xf32>, vector<8x32xf32> -> vector<16x32xf32>
    %c0_5 = arith.constant 0 : index
    %c0_6 = arith.constant 0 : index
    %5 = vector.load %arg7[%c0_5, %c0_6] : memref<32x32xf32, #tpu.memory_space<vmem>>, vector<32x32xf32>
    %cst = arith.constant dense<0.000000e+00> : vector<8x32xf32>
    %6 = tpu.matmul %1, %5, %cst {dimension_numbers = #tpu.dot_dimension_numbers<[1], [0], [0], [1], [0, 0, 1, 1], [], []>} : vector<8x32xf32>, vector<32x32xf32>, vector<8x32xf32> -> vector<8x32xf32>
    %c0_7 = arith.constant 0 : index
    %c0_8 = arith.constant 0 : index
    %7 = vector.load %arg8[%c0_7, %c0_8] : memref<1x32xf32, #tpu.memory_space<vmem>>, vector<1x32xf32>
    %8 = vector.shape_cast %7 : vector<1x32xf32> to vector<32xf32>
    %9 = vector.shape_cast %8 : vector<32xf32> to vector<1x32xf32>
    %10 = vector.broadcast %9 : vector<1x32xf32> to vector<8x32xf32>
    %11 = arith.addf %6, %10 : vector<8x32xf32>
    %c0_9 = arith.constant 0 : index
    %c0_10 = arith.constant 0 : index
    %c0_11 = arith.constant 0 : index
    %12 = vector.load %arg3[%c0_9, %c0_10, %c0_11] : memref<4x32x8xf32, #tpu.memory_space<vmem>>, vector<1x32x8xf32>
    %13 = vector.shape_cast %12 : vector<1x32x8xf32> to vector<32x8xf32>
    %cst_12 = arith.constant dense<0.000000e+00> : vector<8x8xf32>
    %14 = tpu.matmul %1, %13, %cst_12 {dimension_numbers = #tpu.dot_dimension_numbers<[1], [0], [0], [1], [0, 0, 1, 1], [], []>} : vector<8x32xf32>, vector<32x8xf32>, vector<8x8xf32> -> vector<8x8xf32>
    %c0_13 = arith.constant 0 : index
    %c0_14 = arith.constant 0 : index
    %c0_15 = arith.constant 0 : index
    %15 = vector.load %arg4[%c0_13, %c0_14, %c0_15] : memref<4x32x8xf32, #tpu.memory_space<vmem>>, vector<1x32x8xf32>
    %16 = vector.shape_cast %15 : vector<1x32x8xf32> to vector<32x8xf32>
    %cst_16 = arith.constant dense<0.000000e+00> : vector<16x8xf32>
    %17 = tpu.matmul %4, %16, %cst_16 {dimension_numbers = #tpu.dot_dimension_numbers<[1], [0], [0], [1], [0, 0, 1, 1], [], []>} : vector<16x32xf32>, vector<32x8xf32>, vector<16x8xf32> -> vector<16x8xf32>
    %c0_17 = arith.constant 0 : index
    %c0_18 = arith.constant 0 : index
    %c0_19 = arith.constant 0 : index
    %18 = vector.load %arg5[%c0_17, %c0_18, %c0_19] : memref<4x32x8xf32, #tpu.memory_space<vmem>>, vector<1x32x8xf32>
    %19 = vector.shape_cast %18 : vector<1x32x8xf32> to vector<32x8xf32>
    %cst_20 = arith.constant dense<0.000000e+00> : vector<16x8xf32>
    %20 = tpu.matmul %4, %19, %cst_20 {dimension_numbers = #tpu.dot_dimension_numbers<[1], [0], [0], [1], [0, 0, 1, 1], [], []>} : vector<16x32xf32>, vector<32x8xf32>, vector<16x8xf32> -> vector<16x8xf32>
    %cst_21 = arith.constant dense<0.000000e+00> : vector<8x16xf32>
    %21 = tpu.matmul %14, %17, %cst_21 {dimension_numbers = #tpu.dot_dimension_numbers<[1], [1], [0], [0], [0, 0, 1, 0], [], []>} : vector<8x8xf32>, vector<16x8xf32>, vector<8x16xf32> -> vector<8x16xf32>
    %cst_22 = arith.constant 0.353553385 : f32
    %22 = vector.broadcast %cst_22 : f32 to vector<8x16xf32>
    %23 = arith.mulf %21, %22 : vector<8x16xf32>
    %cst_23 = arith.constant dense<0xFF800000> : vector<8xf32>
    %24 = vector.multi_reduction <maximumf>, %23, %cst_23 [1] : vector<8x16xf32> to vector<8xf32>
    %25 = vector.shape_cast %24 : vector<8xf32> to vector<8x1xf32>
    %26 = vector.broadcast %25 : vector<8x1xf32> to vector<8x16xf32>
    %27 = arith.subf %23, %26 : vector<8x16xf32>
    %28 = math.exp %27 : vector<8x16xf32>
    %cst_24 = arith.constant dense<0.000000e+00> : vector<8xf32>
    %29 = vector.multi_reduction <add>, %28, %cst_24 [1] : vector<8x16xf32> to vector<8xf32>
    %30 = vector.shape_cast %29 : vector<8xf32> to vector<8x1xf32>
    %31 = vector.broadcast %30 : vector<8x1xf32> to vector<8x16xf32>
    %32 = arith.divf %28, %31 : vector<8x16xf32>
    %cst_25 = arith.constant dense<0.000000e+00> : vector<8x8xf32>
    %33 = tpu.matmul %32, %20, %cst_25 {dimension_numbers = #tpu.dot_dimension_numbers<[1], [0], [0], [1], [0, 0, 1, 1], [], []>} : vector<8x16xf32>, vector<16x8xf32>, vector<8x8xf32> -> vector<8x8xf32>
    %c0_26 = arith.constant 0 : index
    %c0_27 = arith.constant 0 : index
    %c0_28 = arith.constant 0 : index
    %34 = vector.load %arg6[%c0_26, %c0_27, %c0_28] : memref<4x8x32xf32, #tpu.memory_space<vmem>>, vector<1x8x32xf32>
    %35 = vector.shape_cast %34 : vector<1x8x32xf32> to vector<8x32xf32>
    %cst_29 = arith.constant dense<0.000000e+00> : vector<8x32xf32>
    %36 = tpu.matmul %33, %35, %cst_29 {dimension_numbers = #tpu.dot_dimension_numbers<[1], [0], [0], [1], [0, 0, 1, 1], [], []>} : vector<8x8xf32>, vector<8x32xf32>, vector<8x32xf32> -> vector<8x32xf32>
    %37 = arith.addf %11, %36 : vector<8x32xf32>
    %c1 = arith.constant 1 : index
    %c0_30 = arith.constant 0 : index
    %c0_31 = arith.constant 0 : index
    %38 = vector.load %arg3[%c1, %c0_30, %c0_31] : memref<4x32x8xf32, #tpu.memory_space<vmem>>, vector<1x32x8xf32>
    %39 = vector.shape_cast %38 : vector<1x32x8xf32> to vector<32x8xf32>
    %cst_32 = arith.constant dense<0.000000e+00> : vector<8x8xf32>
    %40 = tpu.matmul %1, %39, %cst_32 {dimension_numbers = #tpu.dot_dimension_numbers<[1], [0], [0], [1], [0, 0, 1, 1], [], []>} : vector<8x32xf32>, vector<32x8xf32>, vector<8x8xf32> -> vector<8x8xf32>
    %c1_33 = arith.constant 1 : index
    %c0_34 = arith.constant 0 : index
    %c0_35 = arith.constant 0 : index
    %41 = vector.load %arg4[%c1_33, %c0_34, %c0_35] : memref<4x32x8xf32, #tpu.memory_space<vmem>>, vector<1x32x8xf32>
    %42 = vector.shape_cast %41 : vector<1x32x8xf32> to vector<32x8xf32>
    %cst_36 = arith.constant dense<0.000000e+00> : vector<16x8xf32>
    %43 = tpu.matmul %4, %42, %cst_36 {dimension_numbers = #tpu.dot_dimension_numbers<[1], [0], [0], [1], [0, 0, 1, 1], [], []>} : vector<16x32xf32>, vector<32x8xf32>, vector<16x8xf32> -> vector<16x8xf32>
    %c1_37 = arith.constant 1 : index
    %c0_38 = arith.constant 0 : index
    %c0_39 = arith.constant 0 : index
    %44 = vector.load %arg5[%c1_37, %c0_38, %c0_39] : memref<4x32x8xf32, #tpu.memory_space<vmem>>, vector<1x32x8xf32>
    %45 = vector.shape_cast %44 : vector<1x32x8xf32> to vector<32x8xf32>
    %cst_40 = arith.constant dense<0.000000e+00> : vector<16x8xf32>
    %46 = tpu.matmul %4, %45, %cst_40 {dimension_numbers = #tpu.dot_dimension_numbers<[1], [0], [0], [1], [0, 0, 1, 1], [], []>} : vector<16x32xf32>, vector<32x8xf32>, vector<16x8xf32> -> vector<16x8xf32>
    %cst_41 = arith.constant dense<0.000000e+00> : vector<8x16xf32>
    %47 = tpu.matmul %40, %43, %cst_41 {dimension_numbers = #tpu.dot_dimension_numbers<[1], [1], [0], [0], [0, 0, 1, 0], [], []>} : vector<8x8xf32>, vector<16x8xf32>, vector<8x16xf32> -> vector<8x16xf32>
    %cst_42 = arith.constant 0.353553385 : f32
    %48 = vector.broadcast %cst_42 : f32 to vector<8x16xf32>
    %49 = arith.mulf %47, %48 : vector<8x16xf32>
    %cst_43 = arith.constant dense<0xFF800000> : vector<8xf32>
    %50 = vector.multi_reduction <maximumf>, %49, %cst_43 [1] : vector<8x16xf32> to vector<8xf32>
    %51 = vector.shape_cast %50 : vector<8xf32> to vector<8x1xf32>
    %52 = vector.broadcast %51 : vector<8x1xf32> to vector<8x16xf32>
    %53 = arith.subf %49, %52 : vector<8x16xf32>
    %54 = math.exp %53 : vector<8x16xf32>
    %cst_44 = arith.constant dense<0.000000e+00> : vector<8xf32>
    %55 = vector.multi_reduction <add>, %54, %cst_44 [1] : vector<8x16xf32> to vector<8xf32>
    %56 = vector.shape_cast %55 : vector<8xf32> to vector<8x1xf32>
    %57 = vector.broadcast %56 : vector<8x1xf32> to vector<8x16xf32>
    %58 = arith.divf %54, %57 : vector<8x16xf32>
    %cst_45 = arith.constant dense<0.000000e+00> : vector<8x8xf32>
    %59 = tpu.matmul %58, %46, %cst_45 {dimension_numbers = #tpu.dot_dimension_numbers<[1], [0], [0], [1], [0, 0, 1, 1], [], []>} : vector<8x16xf32>, vector<16x8xf32>, vector<8x8xf32> -> vector<8x8xf32>
    %c1_46 = arith.constant 1 : index
    %c0_47 = arith.constant 0 : index
    %c0_48 = arith.constant 0 : index
    %60 = vector.load %arg6[%c1_46, %c0_47, %c0_48] : memref<4x8x32xf32, #tpu.memory_space<vmem>>, vector<1x8x32xf32>
    %61 = vector.shape_cast %60 : vector<1x8x32xf32> to vector<8x32xf32>
    %cst_49 = arith.constant dense<0.000000e+00> : vector<8x32xf32>
    %62 = tpu.matmul %59, %61, %cst_49 {dimension_numbers = #tpu.dot_dimension_numbers<[1], [0], [0], [1], [0, 0, 1, 1], [], []>} : vector<8x8xf32>, vector<8x32xf32>, vector<8x32xf32> -> vector<8x32xf32>
    %63 = arith.addf %37, %62 : vector<8x32xf32>
    %c2 = arith.constant 2 : index
    %c0_50 = arith.constant 0 : index
    %c0_51 = arith.constant 0 : index
    %64 = vector.load %arg3[%c2, %c0_50, %c0_51] : memref<4x32x8xf32, #tpu.memory_space<vmem>>, vector<1x32x8xf32>
    %65 = vector.shape_cast %64 : vector<1x32x8xf32> to vector<32x8xf32>
    %cst_52 = arith.constant dense<0.000000e+00> : vector<8x8xf32>
    %66 = tpu.matmul %1, %65, %cst_52 {dimension_numbers = #tpu.dot_dimension_numbers<[1], [0], [0], [1], [0, 0, 1, 1], [], []>} : vector<8x32xf32>, vector<32x8xf32>, vector<8x8xf32> -> vector<8x8xf32>
    %c2_53 = arith.constant 2 : index
    %c0_54 = arith.constant 0 : index
    %c0_55 = arith.constant 0 : index
    %67 = vector.load %arg4[%c2_53, %c0_54, %c0_55] : memref<4x32x8xf32, #tpu.memory_space<vmem>>, vector<1x32x8xf32>
    %68 = vector.shape_cast %67 : vector<1x32x8xf32> to vector<32x8xf32>
    %cst_56 = arith.constant dense<0.000000e+00> : vector<16x8xf32>
    %69 = tpu.matmul %4, %68, %cst_56 {dimension_numbers = #tpu.dot_dimension_numbers<[1], [0], [0], [1], [0, 0, 1, 1], [], []>} : vector<16x32xf32>, vector<32x8xf32>, vector<16x8xf32> -> vector<16x8xf32>
    %c2_57 = arith.constant 2 : index
    %c0_58 = arith.constant 0 : index
    %c0_59 = arith.constant 0 : index
    %70 = vector.load %arg5[%c2_57, %c0_58, %c0_59] : memref<4x32x8xf32, #tpu.memory_space<vmem>>, vector<1x32x8xf32>
    %71 = vector.shape_cast %70 : vector<1x32x8xf32> to vector<32x8xf32>
    %cst_60 = arith.constant dense<0.000000e+00> : vector<16x8xf32>
    %72 = tpu.matmul %4, %71, %cst_60 {dimension_numbers = #tpu.dot_dimension_numbers<[1], [0], [0], [1], [0, 0, 1, 1], [], []>} : vector<16x32xf32>, vector<32x8xf32>, vector<16x8xf32> -> vector<16x8xf32>
    %cst_61 = arith.constant dense<0.000000e+00> : vector<8x16xf32>
    %73 = tpu.matmul %66, %69, %cst_61 {dimension_numbers = #tpu.dot_dimension_numbers<[1], [1], [0], [0], [0, 0, 1, 0], [], []>} : vector<8x8xf32>, vector<16x8xf32>, vector<8x16xf32> -> vector<8x16xf32>
    %cst_62 = arith.constant 0.353553385 : f32
    %74 = vector.broadcast %cst_62 : f32 to vector<8x16xf32>
    %75 = arith.mulf %73, %74 : vector<8x16xf32>
    %cst_63 = arith.constant dense<0xFF800000> : vector<8xf32>
    %76 = vector.multi_reduction <maximumf>, %75, %cst_63 [1] : vector<8x16xf32> to vector<8xf32>
    %77 = vector.shape_cast %76 : vector<8xf32> to vector<8x1xf32>
    %78 = vector.broadcast %77 : vector<8x1xf32> to vector<8x16xf32>
    %79 = arith.subf %75, %78 : vector<8x16xf32>
    %80 = math.exp %79 : vector<8x16xf32>
    %cst_64 = arith.constant dense<0.000000e+00> : vector<8xf32>
    %81 = vector.multi_reduction <add>, %80, %cst_64 [1] : vector<8x16xf32> to vector<8xf32>
    %82 = vector.shape_cast %81 : vector<8xf32> to vector<8x1xf32>
    %83 = vector.broadcast %82 : vector<8x1xf32> to vector<8x16xf32>
    %84 = arith.divf %80, %83 : vector<8x16xf32>
    %cst_65 = arith.constant dense<0.000000e+00> : vector<8x8xf32>
    %85 = tpu.matmul %84, %72, %cst_65 {dimension_numbers = #tpu.dot_dimension_numbers<[1], [0], [0], [1], [0, 0, 1, 1], [], []>} : vector<8x16xf32>, vector<16x8xf32>, vector<8x8xf32> -> vector<8x8xf32>
    %c2_66 = arith.constant 2 : index
    %c0_67 = arith.constant 0 : index
    %c0_68 = arith.constant 0 : index
    %86 = vector.load %arg6[%c2_66, %c0_67, %c0_68] : memref<4x8x32xf32, #tpu.memory_space<vmem>>, vector<1x8x32xf32>
    %87 = vector.shape_cast %86 : vector<1x8x32xf32> to vector<8x32xf32>
    %cst_69 = arith.constant dense<0.000000e+00> : vector<8x32xf32>
    %88 = tpu.matmul %85, %87, %cst_69 {dimension_numbers = #tpu.dot_dimension_numbers<[1], [0], [0], [1], [0, 0, 1, 1], [], []>} : vector<8x8xf32>, vector<8x32xf32>, vector<8x32xf32> -> vector<8x32xf32>
    %89 = arith.addf %63, %88 : vector<8x32xf32>
    %c3 = arith.constant 3 : index
    %c0_70 = arith.constant 0 : index
    %c0_71 = arith.constant 0 : index
    %90 = vector.load %arg3[%c3, %c0_70, %c0_71] : memref<4x32x8xf32, #tpu.memory_space<vmem>>, vector<1x32x8xf32>
    %91 = vector.shape_cast %90 : vector<1x32x8xf32> to vector<32x8xf32>
    %cst_72 = arith.constant dense<0.000000e+00> : vector<8x8xf32>
    %92 = tpu.matmul %1, %91, %cst_72 {dimension_numbers = #tpu.dot_dimension_numbers<[1], [0], [0], [1], [0, 0, 1, 1], [], []>} : vector<8x32xf32>, vector<32x8xf32>, vector<8x8xf32> -> vector<8x8xf32>
    %c3_73 = arith.constant 3 : index
    %c0_74 = arith.constant 0 : index
    %c0_75 = arith.constant 0 : index
    %93 = vector.load %arg4[%c3_73, %c0_74, %c0_75] : memref<4x32x8xf32, #tpu.memory_space<vmem>>, vector<1x32x8xf32>
    %94 = vector.shape_cast %93 : vector<1x32x8xf32> to vector<32x8xf32>
    %cst_76 = arith.constant dense<0.000000e+00> : vector<16x8xf32>
    %95 = tpu.matmul %4, %94, %cst_76 {dimension_numbers = #tpu.dot_dimension_numbers<[1], [0], [0], [1], [0, 0, 1, 1], [], []>} : vector<16x32xf32>, vector<32x8xf32>, vector<16x8xf32> -> vector<16x8xf32>
    %c3_77 = arith.constant 3 : index
    %c0_78 = arith.constant 0 : index
    %c0_79 = arith.constant 0 : index
    %96 = vector.load %arg5[%c3_77, %c0_78, %c0_79] : memref<4x32x8xf32, #tpu.memory_space<vmem>>, vector<1x32x8xf32>
    %97 = vector.shape_cast %96 : vector<1x32x8xf32> to vector<32x8xf32>
    %cst_80 = arith.constant dense<0.000000e+00> : vector<16x8xf32>
    %98 = tpu.matmul %4, %97, %cst_80 {dimension_numbers = #tpu.dot_dimension_numbers<[1], [0], [0], [1], [0, 0, 1, 1], [], []>} : vector<16x32xf32>, vector<32x8xf32>, vector<16x8xf32> -> vector<16x8xf32>
    %cst_81 = arith.constant dense<0.000000e+00> : vector<8x16xf32>
    %99 = tpu.matmul %92, %95, %cst_81 {dimension_numbers = #tpu.dot_dimension_numbers<[1], [1], [0], [0], [0, 0, 1, 0], [], []>} : vector<8x8xf32>, vector<16x8xf32>, vector<8x16xf32> -> vector<8x16xf32>
    %cst_82 = arith.constant 0.353553385 : f32
    %100 = vector.broadcast %cst_82 : f32 to vector<8x16xf32>
    %101 = arith.mulf %99, %100 : vector<8x16xf32>
    %cst_83 = arith.constant dense<0xFF800000> : vector<8xf32>
    %102 = vector.multi_reduction <maximumf>, %101, %cst_83 [1] : vector<8x16xf32> to vector<8xf32>
    %103 = vector.shape_cast %102 : vector<8xf32> to vector<8x1xf32>
    %104 = vector.broadcast %103 : vector<8x1xf32> to vector<8x16xf32>
    %105 = arith.subf %101, %104 : vector<8x16xf32>
    %106 = math.exp %105 : vector<8x16xf32>
    %cst_84 = arith.constant dense<0.000000e+00> : vector<8xf32>
    %107 = vector.multi_reduction <add>, %106, %cst_84 [1] : vector<8x16xf32> to vector<8xf32>
    %108 = vector.shape_cast %107 : vector<8xf32> to vector<8x1xf32>
    %109 = vector.broadcast %108 : vector<8x1xf32> to vector<8x16xf32>
    %110 = arith.divf %106, %109 : vector<8x16xf32>
    %cst_85 = arith.constant dense<0.000000e+00> : vector<8x8xf32>
    %111 = tpu.matmul %110, %98, %cst_85 {dimension_numbers = #tpu.dot_dimension_numbers<[1], [0], [0], [1], [0, 0, 1, 1], [], []>} : vector<8x16xf32>, vector<16x8xf32>, vector<8x8xf32> -> vector<8x8xf32>
    %c3_86 = arith.constant 3 : index
    %c0_87 = arith.constant 0 : index
    %c0_88 = arith.constant 0 : index
    %112 = vector.load %arg6[%c3_86, %c0_87, %c0_88] : memref<4x8x32xf32, #tpu.memory_space<vmem>>, vector<1x8x32xf32>
    %113 = vector.shape_cast %112 : vector<1x8x32xf32> to vector<8x32xf32>
    %cst_89 = arith.constant dense<0.000000e+00> : vector<8x32xf32>
    %114 = tpu.matmul %111, %113, %cst_89 {dimension_numbers = #tpu.dot_dimension_numbers<[1], [0], [0], [1], [0, 0, 1, 1], [], []>} : vector<8x8xf32>, vector<8x32xf32>, vector<8x32xf32> -> vector<8x32xf32>
    %115 = arith.addf %89, %114 : vector<8x32xf32>
    %c0_90 = arith.constant 0 : index
    %c0_91 = arith.constant 0 : index
    %c0_92 = arith.constant 0 : index
    %116 = vector.load %arg9[%c0_90, %c0_91, %c0_92] : memref<1x8x32xf32, #tpu.memory_space<vmem>>, vector<1x8x32xf32>
    %117 = vector.shape_cast %116 : vector<1x8x32xf32> to vector<8x32xf32>
    %118 = vector.shape_cast %115 : vector<8x32xf32> to vector<1x8x32xf32>
    tpu.vector_store %arg9[%c0_90, %c0_91, %c0_92], %118 {strides = array<i32>} : memref<1x8x32xf32, #tpu.memory_space<vmem>>, vector<1x8x32xf32>,
    return
  }
  func.func @transform_0(%arg0: i32) -> (i32, i32, i32) {
    %c0_i32 = arith.constant 0 : i32
    %c0_i32_0 = arith.constant 0 : i32
    %c0_i32_1 = arith.constant 0 : i32
    return %arg0, %c0_i32, %c0_i32_0 : i32, i32, i32
  }
  func.func @transform_1(%arg0: i32) -> (i32, i32, i32) {
    %c0_i32 = arith.constant 0 : i32
    %c0_i32_0 = arith.constant 0 : i32
    %c0_i32_1 = arith.constant 0 : i32
    return %arg0, %c0_i32, %c0_i32_0 : i32, i32, i32
  }
  func.func @transform_2(%arg0: i32) -> (i32, i32, i32) {
    %c0_i32 = arith.constant 0 : i32
    %c0_i32_0 = arith.constant 0 : i32
    %c0_i32_1 = arith.constant 0 : i32
    %c0_i32_2 = arith.constant 0 : i32
    return %c0_i32, %c0_i32_0, %c0_i32_1 : i32, i32, i32
  }
  func.func @transform_3(%arg0: i32) -> (i32, i32, i32) {
    %c0_i32 = arith.constant 0 : i32
    %c0_i32_0 = arith.constant 0 : i32
    %c0_i32_1 = arith.constant 0 : i32
    %c0_i32_2 = arith.constant 0 : i32
    return %c0_i32, %c0_i32_0, %c0_i32_1 : i32, i32, i32
  }
  func.func @transform_4(%arg0: i32) -> (i32, i32, i32) {
    %c0_i32 = arith.constant 0 : i32
    %c0_i32_0 = arith.constant 0 : i32
    %c0_i32_1 = arith.constant 0 : i32
    %c0_i32_2 = arith.constant 0 : i32
    return %c0_i32, %c0_i32_0, %c0_i32_1 : i32, i32, i32
  }
  func.func @transform_5(%arg0: i32) -> (i32, i32, i32) {
    %c0_i32 = arith.constant 0 : i32
    %c0_i32_0 = arith.constant 0 : i32
    %c0_i32_1 = arith.constant 0 : i32
    %c0_i32_2 = arith.constant 0 : i32
    return %c0_i32, %c0_i32_0, %c0_i32_1 : i32, i32, i32
  }
  func.func @transform_6(%arg0: i32) -> (i32, i32) {
    %c0_i32 = arith.constant 0 : i32
    %c0_i32_0 = arith.constant 0 : i32
    %c0_i32_1 = arith.constant 0 : i32
    return %c0_i32, %c0_i32_0 : i32, i32
  }
  func.func @transform_7(%arg0: i32) -> (i32, i32) {
    %c0_i32 = arith.constant 0 : i32
    %c0_i32_0 = arith.constant 0 : i32
    %c0_i32_1 = arith.constant 0 : i32
    return %c0_i32, %c0_i32_0 : i32, i32
  }
  func.func @transform_8(%arg0: i32) -> (i32, i32, i32) {
    %c0_i32 = arith.constant 0 : i32
    %c0_i32_0 = arith.constant 0 : i32
    %c0_i32_1 = arith.constant 0 : i32
    return %arg0, %c0_i32, %c0_i32_0 : i32, i32, i32
  }
}

</mosaic_0001>

<bundles_post_ra>
// kernel: mhca_forward.1
= control target key start
LH: loop header
LB: loop body
LE: loop exit
PB: predicated region body
PF: predicated region fallthrough
CT: control target
= control target key end

     0   :  { %13 = vsyncpa [#allocation3], 0  ;;  %s1776_s0 = inlined_call_operand.vmem [shape: f32[2,8,32], index: 0, kind: input, shape index: {}]   ;;  %s1777_s1 = inlined_call_operand.vmem [shape: f32[2,8,32], index: 1, kind: input, shape index: {}]   ;;  %s1778_s2 = inlined_call_operand.vmem [shape: f32[4,32,8], index: 2, kind: input, shape index: {}]   ;;  %s1779_s3 = inlined_call_operand.vmem [shape: f32[4,32,8], index: 3, kind: input, shape index: {}]   ;;  %s1780_s4 = inlined_call_operand.vmem [shape: f32[4,32,8], index: 4, kind: input, shape index: {}]   ;;  %s1781_s5 = inlined_call_operand.vmem [shape: f32[4,8,32], index: 5, kind: input, shape index: {}, may-alias: {5,6}]   ;;  %s1782_s6 = inlined_call_operand.vmem [shape: f32[32,32], index: 6, kind: input, shape index: {}, may-alias: {5,6}]   ;;  %s1783_s7 = inlined_call_operand.vmem [shape: f32[1,32], index: 7, kind: input, shape index: {}]   ;;  %s1784_s8 = inlined_call_operand.hbm [shape: f32[2,8,32], index: 8, kind: output, shape index: {}]  }
   0x1   :  { %15 = vsyncpa [#allocation3 + $0x1], 0  ;;  %s1433_s27 = smov 0   ;;  %s1435_s28 = smov 0  }
   0x2   :  { %s1437_s29 = smov 0   ;;  %s1439_s30 = smov 0  }
   0x3 LB: > { %s1454_s9 = sadd.s32 4294967295, %s1386_s30   ;;  %s1177_s10 = sadd.s32 4294967294, %s1386_s30   ;;  %s1386_s30 = sphi %s1439_s30, %s1790_s30   ;;  %s1382_s29 = sphi %s1437_s29, %s1789_s29   ;;  %s1378_s28 = sphi %s1435_s28, %s1788_s28   ;;  %s1374_s27 = sphi %s1433_s27, %s1787_s27  }
   0x4   : > { %s1458_s11 = sadd.s32 1, %s1386_s30   ;;  %s206_s12 = sadd.s32 1, %s1382_s29 }
   0x5   : > { %s203_s13 = ssub.s32 %s1386_s30, %s1458_s11  ;;  %p216_p0 = scmp.ne.s32.totalorder %s1382_s29, %s1378_s28 }
   0x6   : > { %p204_p1 = scmp.eq.s32.totalorder %s203_s13, 0  ;;  %p217_p2 = scmp.eq.s32.totalorder %s1454_s9, 1 }
   0x7   : > { %p222_p3 = scmp.ne.s32.totalorder %s1378_s28, %s1374_s27  ;;  %p223_p4 = scmp.eq.s32.totalorder %s1177_s10, 1 }
   0x8   : > { %s1469_s14 = scalar_select %p204_p1, %s1382_s29, %s206_s12  }
   0x9   : > { %p1471_p5 = por %p217_p2, %p216_p0  ;;  %p1475_p6 = por %p223_p4, %p222_p3 }
   0xa   : > { %p1180_p7 = scmp.ge.s32.totalorder %s1386_s30, 1  ;;  %p273_p8 = scmp.lt.s32.totalorder %s1386_s30, 3 }
   0xc   : > { %p274_p9 = pnand %p1180_p7, %p273_p8 }
   0xd   : > { %p310_p10 = scmp.lt.s32.totalorder (!%p274_p9), %s1454_s9, 1  ;;  %s1265_s24 = sshll.u32 (!%p274_p9), %s1454_s9, 3 }
   0xe   : > { %277 = sbr.rel (%p274_p9) target bundleno = 2401 (0x961), region = 52 }
  0x13   : > { %v379_v0 = vld [vmem:[%s1779_s3 + $0x18] sm:$0xff]  ;;  %v378_v1 = vld [vmem:[%s1779_s3 + $0x10] sm:$0xff]  ;;  %v377_v4 = vld [vmem:[%s1779_s3 + $0x8] sm:$0xff]  ;;  %s311_s10 = scalar_select %p310_p10, %s1454_s9, 1  ;;  %vm328_vm0 = vcmask 261120   ;;  %vm433_vm1 = vcmask 64512  }
  0x14   : > { %395 = vmatpush.msra.mxu2 %v379_v0  ;;  %v355_v2 = vld [vmem:[%s1778_s2 + $0x18] sm:$0xff]  ;;  %v354_v3 = vld [vmem:[%s1778_s2 + $0x10] sm:$0xff]  ;;  %v353_v5 = vld [vmem:[%s1778_s2 + $0x8] sm:$0xff]  ;;  %vm464_vm2 = vcmask 130048  }
  0x15   : > { %368 = vmatpush.msra.mxu1 %v355_v2  ;;  %v376_v6 = vld [vmem:[%s1779_s3] sm:$0xff]  ;;  %s1182_s19 = sshll.u32 %s311_s10, 3  ;;  %v323_v10 = vld [vmem:[%s1782_s6 + $0x18] sm:$0xff]  ;;  %v322_v11 = vld [vmem:[%s1782_s6 + $0x10] sm:$0xff] }
  0x16   : > { %396 = vmatpush.msra.mxu2 %v378_v1  ;;  %s313_s22 = scalar_lea.vmem %s1776_s0, %s1182_s19  ;;  %v352_v7 = vld [vmem:[%s1778_s2] sm:$0xff]  ;;  %s317_s10 = scalar_lea.vmem %s1777_s1, %s1182_s19  ;;  %344 = vmatpush.msra.mxu0 %v323_v10  ;;  %v321_v12 = vld [vmem:[%s1782_s6 + $0x8] sm:$0xff]  ;;  %v409_v17 = vld [vmem:[%s1780_s4 + $0x18] sm:$0xff] }
  0x17   : > { %369 = vmatpush.msra.mxu1 %v354_v3  ;;  %v1510_v8 = vld [vmem:[%s313_s22] sm:$0xff]  ;;  %v408_v18 = vld [vmem:[%s1780_s4 + $0x10] sm:$0xff]  ;;  %422 = vmatpush.msra.mxu3 %v409_v17  ;;  %v407_v19 = vld [vmem:[%s1780_s4 + $0x8] sm:$0xff]  ;;  %s307_s22 = sand.u32 1, %s1378_s28  }
  0x18   : > { %397 = vmatpush.msra.mxu2 %v377_v4  ;;  %v1519_v9 = vld [vmem:[%s317_s10] sm:$0xff]  ;;  %345 = vmatpush.msra.mxu0 %v322_v11  ;;  %v1203_v25 = vld [vmem:[%s1779_s3 + $0x38] sm:$0xff]  ;;  %v1202_v26 = vld [vmem:[%s1779_s3 + $0x30] sm:$0xff]  ;;  %s1181_s23 = sshll.u32 %s307_s22, 3  ;;  %s1101_s10 = scalar_lea.hbm %s1784_s8, %s1265_s24 }
  0x19   : > { %370 = vmatpush.msra.mxu1 %v353_v5  ;;  %v320_v13 = vld [vmem:[%s1782_s6] sm:$0xff]  ;;  %423 = vmatpush.msra.mxu3 %v408_v18  ;;  %v1201_v27 = vld [vmem:[%s1779_s3 + $0x28] sm:$0xff]  ;;  %v1198_v36 = vld [vmem:[%s1778_s2 + $0x38] sm:$0xff]  ;;  %s309_s12 = scalar_lea.vmem [#allocation2], %s1181_s23  ;;  %s1105_s17 = sshll.u32 %s1101_s10, 4  ;;  %s1106_s17 = int_to_ptr.hbm [resolvable:$true] %s1105_s17 }
  0x1a   : > { %398 = vmatpush.msra.mxu2 %v376_v6  ;;  %346 = vmatpush.msra.mxu0 %v321_v12  ;;  %v406_v20 = vld [vmem:[%s1780_s4] sm:$0xff]  ;;  %v1197_v37 = vld [vmem:[%s1778_s2 + $0x30] sm:$0xff]  ;;  %v1196_v38 = vld [vmem:[%s1778_s2 + $0x28] sm:$0xff]  ;;  %s1103_s13 = sshll.u32 %s309_s12, 4  ;;  %s1091_s18 = scalar_lea.sflag [#allocation3], %s307_s22  ;;  %s1104_s13 = int_to_ptr.vmem [resolvable:$true] %s1103_s13 }
  0x1b   : > { %1186 = vmatmul.msk.f32.vlgmr.msra.gmra.mxu2 %vm328_vm0, %v1510_v8  ;;  %371 = vmatpush.msra.mxu1 %v352_v7  ;;  %v1200_v28 = vld [vmem:[%s1779_s3 + $0x20] sm:$0xff]  ;;  %v1209_v57 = vld [vmem:[%s1780_s4 + $0x38] sm:$0xff]  ;;  %v1208_v58 = vld [vmem:[%s1780_s4 + $0x30] sm:$0xff]  ;;  %s1338_s20 = sshra.s32 %s1106_s17, 4  ;;  %s1344_s23 = scalar_lea.hbm %s1784_s8, 16  ;;  %s1339_s20 = int_to_ptr.hbm [resolvable:$true] %s1338_s20 }
  0x1c   : > { %1185 = vmatmul.msk.f32.vlgmr.msra.gmra.mxu1 %vm328_vm0, %v1510_v8  ;;  %347 = vmatpush.msra.mxu0 %v320_v13  ;;  %v1195_v39 = vld [vmem:[%s1778_s2 + $0x20] sm:$0xff]  ;;  %v1207_v59 = vld [vmem:[%s1780_s4 + $0x28] sm:$0xff]  ;;  %v1226_v4 = vld [vmem:[%s1779_s3 + $0x58] sm:$0xff]  ;;  %s1340_s21 = scalar_lea.hbm %s1339_s20, 8  ;;  %p1345_p0 = scmp.lt.s32.totalorder %s1339_s20, %s1784_s8 }
  0x1d   : > { %1184 = vmatmul.msk.f32.vlgmr.msra.gmra.mxu0 %vm328_vm0, %v1510_v8  ;;  %424 = vmatpush.msra.mxu3 %v407_v19  ;;  %v512_v41 = vld [vmem:[%s1781_s5] sm:$0xff]  ;;  %v1225_v5 = vld [vmem:[%s1779_s3 + $0x50] sm:$0xff]  ;;  %v1224_v6 = vld [vmem:[%s1779_s3 + $0x48] sm:$0xff]  ;;  %p1341_p11 = scmp.ne.s32.totalorder %s1339_s20, %s1340_s21  ;;  %p1346_p1 = scmp.lt.s32.totalorder %s1344_s23, %s1340_s21 }
  0x1e   : > { %579 = vmatpush.msrb.mxu2 %v1203_v25  ;;  %v1206_v60 = vld [vmem:[%s1780_s4 + $0x20] sm:$0xff]  ;;  %v1221_v17 = vld [vmem:[%s1778_s2 + $0x58] sm:$0xff]  ;;  %v1220_v18 = vld [vmem:[%s1778_s2 + $0x50] sm:$0xff] }
  0x1f   : > { %425 = vmatpush.msra.mxu3 %v406_v20  ;;  %v1307_v61 = vld [vmem:[%s1783_s7] ss:$0 sm:$0xff]  ;;  %v1219_v19 = vld [vmem:[%s1778_s2 + $0x48] sm:$0xff]  ;;  %p1342_p12 = pnand %p1341_p11, %p1471_p5  ;;  %p1347_p2 = por %p1346_p1, %p1345_p0 }
  0x20   : > { %1188 = vmatmul.msk.f32.vlgmr.msra.gmra.mxu3 %vm328_vm0, %v1510_v8  ;;  %580 = vmatpush.msrb.mxu2 %v1202_v26  ;;  %v1223_v7 = vld [vmem:[%s1779_s3 + $0x40] sm:$0xff] }
  0x21   : > { %607 = vmatpush.msrb.mxu3 %v1209_v57  ;;  %v1218_v20 = vld [vmem:[%s1778_s2 + $0x40] sm:$0xff]  ;;  %p1343_p13 = pneg %p1342_p12 }
  0x22   : > { %581 = vmatpush.msrb.mxu2 %v1201_v27 }
  0x23   : > { %1187 = vmatmul.msk.f32.gmra.mxu2 %vm328_vm0, %v1519_v9  ;;  %608 = vmatpush.msrb.mxu3 %v1208_v58  ;;  %v1244_v58 = vld [vmem:[%s1778_s2 + $0x78] sm:$0xff]  ;;  %p1348_p3 = pnand %p1347_p2, %p1343_p13 }
  0x24   : > { %582 = vmatpush.msrb.mxu2 %v1200_v28 }
  0x25   : > { %609 = vmatpush.msrb.mxu3 %v1207_v59  ;;  %v1243_v59 = vld [vmem:[%s1778_s2 + $0x70] sm:$0xff] }
  0x26   : > { %763 = vmatpush.msra.mxu2 %v1226_v4 }
  0x27   : > { %610 = vmatpush.msrb.mxu3 %v1206_v60  ;;  %v1242_v60 = vld [vmem:[%s1778_s2 + $0x68] sm:$0xff] }
  0x28   : > { %1189 = vmatmul.msk.f32.gmra.mxu3 %vm328_vm0, %v1519_v9  ;;  %764 = vmatpush.msra.mxu2 %v1225_v5 }
  0x2a   : > { %765 = vmatpush.msra.mxu2 %v1224_v6 }
  0x2b   : > { %1204 = vmatmul.msk.f32.vlgmr.msrb.gmra.mxu2 %vm328_vm0, %v1510_v8 }
  0x2c   : > { %766 = vmatpush.msra.mxu2 %v1223_v7 }
  0x30   : > { %1210 = vmatmul.msk.f32.vlgmr.msrb.gmra.mxu3 %vm328_vm0, %v1510_v8 }
  0x33   : > { %1205 = vmatmul.msk.f32.gmra.mxu2 %vm328_vm0, %v1519_v9 }
  0x38   : > { %1211 = vmatmul.msk.f32.gmra.mxu3 %vm328_vm0, %v1519_v9 }
  0x3b   : > { %1227 = vmatmul.msk.f32.vlgmr.msra.gmra.mxu2 %vm328_vm0, %v1510_v8 }
  0x43   : > { %1228 = vmatmul.msk.f32.gmra.mxu2 %vm328_vm0, %v1519_v9 }
  0x99   : > { %v373_v16 = vpop.f32.mrf.mxu1 }
  0x9a   : > { %v1556_v21 = vpop.f32.mrf.mxu0 }
  0x9b   : > { %v350_v62 = vadd.f32 %v1307_v61, %v1556_v21  ;;  %v1241_v61 = vld [vmem:[%s1778_s2 + $0x60] sm:$0xff] }
  0x9e   : > { %v400_v14 = vpop.f32.mrf.mxu2 }
  0xa3   : > { %v427_v34 = vpop.f32.mrf.mxu3 }
  0xa6   : > { %v403_v15 = vpop.f32.mrf.mxu2 }
  0xa7   : > { %1190 = vmatpush.xpose.msk.msrb.mxu0 %vm433_vm1, %v403_v15 }
  0xab   : > { %1191 = vmatpush.xpose.msk.msrb.mxu0 %vm433_vm1, %v400_v14  ;;  %v430_v35 = vpop.f32.mrf.mxu3 }
  0xac   : > { %506 = vmatpush.msrb.mxu1 %v430_v35 }
  0xae   : > { %1192 = vmatmul.msk.f32.vlgmr.msrb.gmra.mxu0 %vm433_vm1, %v373_v16  ;;  %507 = vmatpush.msrb.mxu1 %v427_v34  ;;  %v584_v40 = vpop.f32.mrf.mxu2 }
  0xaf   : > { %531 = vmatpush.msra.mxu0 %v512_v41  ;;  %v1229_v41 = vld [vmem:[%s1780_s4 + $0x40] sm:$0xff] }
  0xb0   : > { %554 = vmatpush.msra.mxu1 %v1198_v36 }
  0xb2   : > { %555 = vmatpush.msra.mxu1 %v1197_v37 }
  0xb3   : > { %v612_v15 = vpop.f32.mrf.mxu3 }
  0xb4   : > { %556 = vmatpush.msra.mxu1 %v1196_v38  ;;  %v1232_v38 = vld [vmem:[%s1780_s4 + $0x58] sm:$0xff] }
  0xb5   : > { %791 = vmatpush.msra.mxu3 %v1232_v38 }
  0xb6   : > { %557 = vmatpush.msra.mxu1 %v1195_v39  ;;  %v587_v43 = vpop.f32.mrf.mxu2  ;;  %v1231_v39 = vld [vmem:[%s1780_s4 + $0x50] sm:$0xff] }
  0xb7   : > { %1212 = vmatpush.xpose.msk.msrb.mxu0 %vm433_vm1, %v587_v43  ;;  %792 = vmatpush.msra.mxu3 %v1231_v39 }
  0xbb   : > { %1213 = vmatpush.xpose.msk.msrb.mxu0 %vm433_vm1, %v584_v40  ;;  %v615_v16 = vpop.f32.mrf.mxu3  ;;  %v1230_v40 = vld [vmem:[%s1780_s4 + $0x48] sm:$0xff] }
  0xbc   : > { %793 = vmatpush.msra.mxu3 %v1230_v40 }
  0xbe   : > { %v768_v21 = vpop.f32.mrf.mxu2  ;;  %794 = vmatpush.msra.mxu3 %v1229_v41 }
  0xbf   : > { %1233 = vmatmul.msk.f32.vlgmr.msra.gmra.mxu3 %vm328_vm0, %v1510_v8 }
  0xc7   : > { %1234 = vmatmul.msk.f32.gmra.mxu3 %vm328_vm0, %v1519_v9 }
 0x12b   : > { %v460_v22 = vpop.f32.mrf.mxu0 }
 0x12c   : > { %v463_v23 = vmul.f32 0.35355338, %v460_v22  ;;  %v1216_v22 = vld [vmem:[%s1781_s5 + $0x8] sm:$0xff] }
 0x12e   : > { %v465_v24 = vsel %vm464_vm2, %v463_v23, -inf }
 0x12f   : > { %466 = vmax.xlane.f32.xlu0 %v465_v24  ;;  %v771_v24 = vpop.f32.mrf.mxu2 }
 0x1a2   : > { %v467_v29 = vpop.xlane.xlu0 %466 }
 0x1a3   : > { %v468_v30 = vsub.f32 %v463_v23, %v467_v29 }
 0x1a5   : > { %v469_v31 = vmul.f32 1.442695, %v468_v30 }
 0x1a7   : > { %1308 = vpow2.f32 %v469_v31 }
 0x1ad   : > { %v1309_v32 = vpop.eup %1308 }
 0x1ae   : > { %v471_v33 = vsel %vm464_vm2, %v1309_v32, 0.0 }
 0x1af   : > { %472 = vadd.xlane.f32.xlu0 %v471_v33 }
 0x222   : > { %v473_v42 = vpop.xlane.xlu0 %472 }
 0x223   : > { %1310 = vrcp.f32 %v473_v42  ;;  %v485_v47 = vand.u32 2147483648, %v473_v42  ;;  %v483_v49 = vand.u32 2147483647, %v473_v42  ;;  %vm479_vm4 = vweird.f32 %v473_v42 }
 0x225   : > { %v486_v51 = vor.u32 1.1754944e-38, %v485_v47  ;;  %vm484_vm6 = vcmp.eq.f32.partialorder %v483_v49, 8.507059e+37  ;;  %v1249_v47 = vld [vmem:[%s1779_s3 + $0x78] sm:$0xff]  ;;  %v1247_v49 = vld [vmem:[%s1779_s3 + $0x68] sm:$0xff] }
 0x226   : > { %947 = vmatpush.msrb.mxu2 %v1249_v47 }
 0x229   : > { %v1311_v44 = vpop.eup %1310 }
 0x22a   : > { %v475_v45 = vmul.f32 %v1311_v44, %v473_v42  ;;  %vm480_vm3 = vweird.f32 %v1311_v44 }
 0x22b   : > { %vm481_vm5 = vmor %vm479_vm4, %vm480_vm3 }
 0x22c   : > { %v476_v46 = vsub.f32 1.0, %v475_v45 }
 0x22e   : > { %v477_v48 = vmul.f32 %v1311_v44, %v476_v46 }
 0x230   : > { %v478_v50 = vadd.f32 %v1311_v44, %v477_v48  ;;  %v1248_v48 = vld [vmem:[%s1779_s3 + $0x70] sm:$0xff] }
 0x231   : > { %948 = vmatpush.msrb.mxu2 %v1248_v48 }
 0x232   : > { %v482_v52 = vsel %vm481_vm5, %v1311_v44, %v478_v50  ;;  %v1246_v50 = vld [vmem:[%s1779_s3 + $0x60] sm:$0xff] }
 0x233   : > { %v487_v53 = vsel %vm484_vm6, %v486_v51, %v482_v52  ;;  %949 = vmatpush.msrb.mxu2 %v1247_v49 }
 0x234   : > { %v488_v54 = vmul.f32 %v1309_v32, %v487_v53 }
 0x235   : > { %950 = vmatpush.msrb.mxu2 %v1246_v50 }
 0x236   : > { %1193 = vmatmul.msk.f32.vlgmr.msrb.gmra.mxu1 %vm464_vm2, %v488_v54  ;;  %1250 = vmatmul.msk.f32.vlgmr.msrb.gmra.mxu2 %vm328_vm0, %v1510_v8 }
 0x237   : > { %689 = vmatpush.msrb.mxu1 %v615_v16 }
 0x239   : > { %690 = vmatpush.msrb.mxu1 %v612_v15 }
 0x23e   : > { %1199 = vmatmul.msk.f32.vlgmr.msra.gmra.mxu1 %vm328_vm0, %v1510_v8  ;;  %1251 = vmatmul.msk.f32.gmra.mxu2 %vm328_vm0, %v1519_v9 }
 0x23f   : > { %738 = vmatpush.msra.mxu1 %v1221_v17  ;;  %v1255_v17 = vld [vmem:[%s1780_s4 + $0x78] sm:$0xff] }
 0x240   : > { %975 = vmatpush.msrb.mxu3 %v1255_v17 }
 0x241   : > { %739 = vmatpush.msra.mxu1 %v1220_v18  ;;  %v1254_v18 = vld [vmem:[%s1780_s4 + $0x70] sm:$0xff] }
 0x242   : > { %976 = vmatpush.msrb.mxu3 %v1254_v18 }
 0x243   : > { %740 = vmatpush.msra.mxu1 %v1219_v19  ;;  %v1253_v19 = vld [vmem:[%s1780_s4 + $0x68] sm:$0xff] }
 0x244   : > { %977 = vmatpush.msrb.mxu3 %v1253_v19 }
 0x245   : > { %741 = vmatpush.msra.mxu1 %v1218_v20  ;;  %v1252_v20 = vld [vmem:[%s1780_s4 + $0x60] sm:$0xff] }
 0x246   : > { %978 = vmatpush.msrb.mxu3 %v1252_v20 }
 0x247   : > { %1256 = vmatmul.msk.f32.vlgmr.msrb.gmra.mxu3 %vm328_vm0, %v1510_v8 }
 0x24f   : > { %1257 = vmatmul.msk.f32.gmra.mxu3 %vm328_vm0, %v1519_v9  ;;  %v1262_v9 = vld [vmem:[%s1781_s5 + $0x18] sm:$0xff] }
 0x2b3   : > { %v509_v55 = vpop.f32.mrf.mxu1 }
 0x2b4   : > { %1194 = vmatmul.msk.f32.vlgmr.msra.gmra.mxu0 %vm433_vm1, %v509_v55 }
 0x2b5   : > { %715 = vmatpush.msra.mxu0 %v1216_v22 }
 0x2bb   : > { %v559_v56 = vpop.f32.mrf.mxu1 }
 0x2bc   : > { %1214 = vmatmul.msk.f32.vlgmr.msrb.gmra.mxu0 %vm433_vm1, %v559_v56  ;;  %v796_v56 = vpop.f32.mrf.mxu3 }
 0x2bd   : > { %1235 = vmatpush.xpose.msk.msrb.mxu0 %vm433_vm1, %v771_v24 }
 0x2c1   : > { %1236 = vmatpush.xpose.msk.msrb.mxu0 %vm433_vm1, %v768_v21 }
 0x2c4   : > { %v799_v57 = vpop.f32.mrf.mxu3 }
 0x331   : > { %v533_v63 = vpop.f32.mrf.mxu0 }
 0x332   : > { %v1618_v0 = vadd.f32 %v533_v63, %v350_v62  ;;  %v952_v62 = vpop.f32.mrf.mxu2  ;;  %v1239_v63 = vld [vmem:[%s1781_s5 + $0x10] sm:$0xff] }
 0x339   : > { %v644_v1 = vpop.f32.mrf.mxu0 }
 0x33a   : > { %v647_v2 = vmul.f32 0.35355338, %v644_v1  ;;  %v955_v1 = vpop.f32.mrf.mxu2 }
 0x33c   : > { %v648_v3 = vsel %vm464_vm2, %v647_v2, -inf }
 0x33d   : > { %649 = vmax.xlane.f32.xlu1 %v648_v3 }
 0x3b0   : > { %v650_v10 = vpop.xlane.xlu1 %649 }
 0x3b1   : > { %v651_v11 = vsub.f32 %v647_v2, %v650_v10 }
 0x3b3   : > { %v652_v12 = vmul.f32 1.442695, %v651_v11 }
 0x3b5   : > { %1312 = vpow2.f32 %v652_v12 }
 0x3bb   : > { %v1313_v13 = vpop.eup %1312 }
 0x3bc   : > { %v654_v14 = vsel %vm464_vm2, %v1313_v13, 0.0 }
 0x3bd   : > { %655 = vadd.xlane.f32.xlu1 %v654_v14 }
 0x430   : > { %v656_v23 = vpop.xlane.xlu1 %655 }
 0x431   : > { %1314 = vrcp.f32 %v656_v23  ;;  %v668_v28 = vand.u32 2147483648, %v656_v23  ;;  %v666_v30 = vand.u32 2147483647, %v656_v23  ;;  %vm662_vm8 = vweird.f32 %v656_v23 }
 0x433   : > { %v669_v32 = vor.u32 1.1754944e-38, %v668_v28  ;;  %vm667_vm10 = vcmp.eq.f32.partialorder %v666_v30, 8.507059e+37 }
 0x437   : > { %v1315_v25 = vpop.eup %1314 }
 0x438   : > { %v658_v26 = vmul.f32 %v1315_v25, %v656_v23  ;;  %vm663_vm7 = vweird.f32 %v1315_v25 }
 0x439   : > { %vm664_vm9 = vmor %vm662_vm8, %vm663_vm7 }
 0x43a   : > { %v659_v27 = vsub.f32 1.0, %v658_v26 }
 0x43c   : > { %v660_v29 = vmul.f32 %v1315_v25, %v659_v27 }
 0x43e   : > { %v661_v31 = vadd.f32 %v1315_v25, %v660_v29 }
 0x440   : > { %v665_v33 = vsel %vm664_vm9, %v1315_v25, %v661_v31 }
 0x441   : > { %v670_v34 = vsel %vm667_vm10, %v669_v32, %v665_v33 }
 0x442   : > { %v671_v35 = vmul.f32 %v1313_v13, %v670_v34 }
 0x444   : > { %1215 = vmatmul.msk.f32.vlgmr.msrb.gmra.mxu1 %vm464_vm2, %v671_v35 }
 0x445   : > { %873 = vmatpush.msrb.mxu1 %v799_v57 }
 0x447   : > { %874 = vmatpush.msrb.mxu1 %v796_v56 }
 0x44c   : > { %1222 = vmatmul.msk.f32.vlgmr.msra.gmra.mxu1 %vm328_vm0, %v1510_v8 }
 0x44d   : > { %922 = vmatpush.msra.mxu1 %v1244_v58 }
 0x44f   : > { %923 = vmatpush.msra.mxu1 %v1243_v59 }
 0x451   : > { %924 = vmatpush.msra.mxu1 %v1242_v60 }
 0x453   : > { %925 = vmatpush.msra.mxu1 %v1241_v61 }
 0x4c1   : > { %v692_v36 = vpop.f32.mrf.mxu1 }
 0x4c2   : > { %1217 = vmatmul.msk.f32.vlgmr.msra.gmra.mxu0 %vm433_vm1, %v692_v36 }
 0x4c3   : > { %899 = vmatpush.msra.mxu0 %v1239_v63 }
 0x4c9   : > { %v743_v37 = vpop.f32.mrf.mxu1 }
 0x4ca   : > { %1237 = vmatmul.msk.f32.vlgmr.msrb.gmra.mxu0 %vm433_vm1, %v743_v37 }
 0x4cb   : > { %1258 = vmatpush.xpose.msk.msrb.mxu0 %vm433_vm1, %v955_v1 }
 0x4cf   : > { %1259 = vmatpush.xpose.msk.msrb.mxu0 %vm433_vm1, %v952_v62 }
 0x53f   : > { %v717_v42 = vpop.f32.mrf.mxu0 }
 0x540   : > { %v1677_v43 = vadd.f32 %v717_v42, %v1618_v0 }
 0x547   : > { %v828_v44 = vpop.f32.mrf.mxu0 }
 0x548   : > { %v831_v45 = vmul.f32 0.35355338, %v828_v44 }
 0x54a   : > { %v832_v46 = vsel %vm464_vm2, %v831_v45, -inf }
 0x54b   : > { %833 = vmax.xlane.f32.xlu2 %v832_v46 }
 0x5be   : > { %v834_v51 = vpop.xlane.xlu2 %833 }
 0x5bf   : > { %v835_v52 = vsub.f32 %v831_v45, %v834_v51 }
 0x5c1   : > { %v836_v53 = vmul.f32 1.442695, %v835_v52 }
 0x5c3   : > { %1316 = vpow2.f32 %v836_v53 }
 0x5c9   : > { %v1317_v54 = vpop.eup %1316 }
 0x5ca   : > { %v838_v55 = vsel %vm464_vm2, %v1317_v54, 0.0 }
 0x5cb   : > { %839 = vadd.xlane.f32.xlu2 %v838_v55 }
 0x63e   : > { %v840_v0 = vpop.xlane.xlu2 %839 }
 0x63f   : > { %1318 = vrcp.f32 %v840_v0  ;;  %v852_v5 = vand.u32 2147483648, %v840_v0  ;;  %v850_v7 = vand.u32 2147483647, %v840_v0  ;;  %vm846_vm12 = vweird.f32 %v840_v0 }
 0x641   : > { %v853_v11 = vor.u32 1.1754944e-38, %v852_v5  ;;  %vm851_vm14 = vcmp.eq.f32.partialorder %v850_v7, 8.507059e+37 }
 0x645   : > { %v1319_v2 = vpop.eup %1318 }
 0x646   : > { %v842_v3 = vmul.f32 %v1319_v2, %v840_v0  ;;  %vm847_vm11 = vweird.f32 %v1319_v2 }
 0x647   : > { %vm848_vm13 = vmor %vm846_vm12, %vm847_vm11 }
 0x648   : > { %v843_v4 = vsub.f32 1.0, %v842_v3 }
 0x64a   : > { %v844_v6 = vmul.f32 %v1319_v2, %v843_v4 }
 0x64c   : > { %v845_v10 = vadd.f32 %v1319_v2, %v844_v6 }
 0x64e   : > { %v849_v12 = vsel %vm848_vm13, %v1319_v2, %v845_v10 }
 0x64f   : > { %v854_v13 = vsel %vm851_vm14, %v853_v11, %v849_v12 }
 0x650   : > { %v855_v14 = vmul.f32 %v1317_v54, %v854_v13 }
 0x652   : > { %1238 = vmatmul.msk.f32.vlgmr.msrb.gmra.mxu1 %vm464_vm2, %v855_v14 }
 0x65a   : > { %1245 = vmatmul.msk.f32.vlgmr.msra.gmra.mxu1 %vm328_vm0, %v1510_v8  ;;  %v980_v8 = vpop.f32.mrf.mxu3 }
 0x662   : > { %v983_v31 = vpop.f32.mrf.mxu3 }
 0x663   : > { %1057 = vmatpush.msrb.mxu1 %v983_v31 }
 0x665   : > { %1058 = vmatpush.msrb.mxu1 %v980_v8 }
 0x6cf   : > { %v876_v15 = vpop.f32.mrf.mxu1 }
 0x6d0   : > { %1240 = vmatmul.msk.f32.vlgmr.msra.gmra.mxu0 %vm433_vm1, %v876_v15 }
 0x6d1   : > { %1083 = vmatpush.msra.mxu0 %v1262_v9 }
 0x6d7   : > { %v927_v16 = vpop.f32.mrf.mxu1 }
 0x6d8   : > { %1260 = vmatmul.msk.f32.vlgmr.msrb.gmra.mxu0 %vm433_vm1, %v927_v16 }
 0x74d   : > { %v901_v21 = vpop.f32.mrf.mxu0 }
 0x74e   : > { %v904_v22 = vadd.f32 %v901_v21, %v1677_v43 }
 0x755   : > { %v1012_v23 = vpop.f32.mrf.mxu0 }
 0x756   : > { %v1015_v24 = vmul.f32 0.35355338, %v1012_v23 }
 0x758   : > { %v1016_v25 = vsel %vm464_vm2, %v1015_v24, -inf }
 0x759   : > { %1017 = vmax.xlane.f32.xlu0 %v1016_v25 }
 0x7cc   : > { %v1018_v26 = vpop.xlane.xlu0 %1017 }
 0x7cd   : > { %v1019_v27 = vsub.f32 %v1015_v24, %v1018_v26 }
 0x7cf   : > { %v1020_v28 = vmul.f32 1.442695, %v1019_v27 }
 0x7d1   : > { %1320 = vpow2.f32 %v1020_v28 }
 0x7d7   : > { %v1321_v29 = vpop.eup %1320 }
 0x7d8   : > { %v1022_v30 = vsel %vm464_vm2, %v1321_v29, 0.0 }
 0x7d9   : > { %1023 = vadd.xlane.f32.xlu1 %v1022_v30 }
 0x84c   : > { %v1024_v32 = vpop.xlane.xlu1 %1023 }
 0x84d   : > { %1322 = vrcp.f32 %v1024_v32  ;;  %v1036_v36 = vand.u32 2147483648, %v1024_v32  ;;  %v1034_v38 = vand.u32 2147483647, %v1024_v32  ;;  %vm1030_vm3 = vweird.f32 %v1024_v32 }
 0x84f   : > { %v1037_v40 = vor.u32 1.1754944e-38, %v1036_v36  ;;  %vm1035_vm5 = vcmp.eq.f32.partialorder %v1034_v38, 8.507059e+37 }
 0x853   : > { %v1323_v33 = vpop.eup %1322 }
 0x854   : > { %v1026_v34 = vmul.f32 %v1323_v33, %v1024_v32  ;;  %vm1031_vm15 = vweird.f32 %v1323_v33 }
 0x855   : > { %vm1032_vm4 = vmor %vm1030_vm3, %vm1031_vm15 }
 0x856   : > { %v1027_v35 = vsub.f32 1.0, %v1026_v34 }
 0x858   : > { %v1028_v37 = vmul.f32 %v1323_v33, %v1027_v35 }
 0x85a   : > { %v1029_v39 = vadd.f32 %v1323_v33, %v1028_v37 }
 0x85c   : > { %v1033_v41 = vsel %vm1032_vm4, %v1323_v33, %v1029_v39 }
 0x85d   : > { %v1038_v42 = vsel %vm1035_vm5, %v1037_v40, %v1033_v41 }
 0x85e   : > { %v1039_v43 = vmul.f32 %v1321_v29, %v1038_v42 }
 0x860   : > { %1261 = vmatmul.msk.f32.vlgmr.msrb.gmra.mxu1 %vm464_vm2, %v1039_v43 }
 0x8dd   : > { %v1060_v44 = vpop.f32.mrf.mxu1 }
 0x8de   : > { %1263 = vmatmul.msk.f32.vlgmr.msra.gmra.mxu0 %vm433_vm1, %v1060_v44 }
 0x95b   : > { %v1085_v45 = vpop.f32.mrf.mxu0 }
 0x95c   : > { %v1088_v46 = vadd.f32 %v1085_v45, %v904_v22 }
 0x95e   : > { %1089 = vst.msk [vmem:[%s309_s12] sm:$0xff] %vm328_vm0, %v1088_v46 }
 0x95f   : > { %1351 = shalt.err (!%p1348_p3)
}
 0x960   : > { %1268 = dma.vmem_to_hbm [thread:$0]  (%p1471_p5), %s1104_s13, 128, %s1106_s17, %s1091_s18  }
 0x961 PF: > { %p1274_p4 = scmp.ge.s32.totalorder %s1386_s30, 2  ;;  %s1117_s22 = sand.u32 1, %s1374_s27  }
 0x962   : > { %s1118_s26 = scalar_lea.sflag [#allocation3], %s1117_s22 }
 0x963   : > { %p1271_p7 = pnand %p1274_p4, %p1475_p6 }
 0x965   : > { %p1272_p8 = pneg %p1271_p7 }
 0x967   : > { %1369 = dma.done.wait (%p1272_p8), %s1118_s26, 128  }
 0x968   : > { %1371 = vsyncadd (%p1272_p8), %s1118_s26, 4294967168  ;;  %p18_p9 = scmp.ge.s32.totalorder %s1458_s11, 4   ;;  %s1787_s27 = smov %s1378_s28 }
 0x969   : > { %s1788_s28 = smov %s1382_s29  ;;  %s1789_s29 = smov %s1469_s14 }
 0x96a   : > { %s1790_s30 = smov %s1458_s11  ;;  %20 = sbr.rel (!%p18_p9) target bundleno = 3 (0x3), region = 102 }
 0x96f   :  { %1124 = vsyncpa [#allocation3], 1 }
 0x970   :  { %1126 = vsyncpa [#allocation3 + $0x1], 1 }

</bundles_post_ra>
